<compile_context>
chip_gen: v5e
topology: v5e:2x2
jax: 0.10.0
libtpu: 0.0.40
codegen_flags: <defaults>
</compile_context>

<pallas_src>
import functools

import jax
import jax.numpy as jnp
from jax.experimental import pallas as pl
from jax.experimental.pallas import tpu as pltpu


def _round_up(x, m):
    return ((x + m - 1) // m) * m


def _vmem_capacity_bytes():
    try:
        return int(pltpu.get_tpu_info().vmem_capacity_bytes)
    except Exception:
        return 64 << 20  # conservative (v7x per-TC) fallback


def _exact_reciprocal(s):
    # EUP approx reciprocal + one Newton-Raphson step -> ~exact (rel err ~1e-6),
    # cost is per-row (shape (T,1)), negligible vs the per-element softmax work.
    inv = pl.reciprocal(s, approx=True)
    return inv * (2.0 - s * inv)


# ----------------------------------------------------------------------------
# Path 1: weight resident in VMEM, tile over rows only.
# ----------------------------------------------------------------------------
def _resident_kernel(x_ref, w_ref, b_ref, o_ref, *, cast_bf16):
    # x_ref: (T, K)  w_ref: (K, N)  b_ref: (1, N)  o_ref: (T, N)
    x = x_ref[...]
    w = w_ref[...]
    if cast_bf16:
        # v5e: f32 MXU is emulated with multiple bf16 passes; feeding bf16
        # operands recovers MXU throughput when the matmul dominates.
        x = x.astype(jnp.bfloat16)
        w = w.astype(jnp.bfloat16)
    logits = jnp.dot(x, w, preferred_element_type=jnp.float32)
    logits = logits + b_ref[...].astype(jnp.float32)
    m = jnp.max(logits, axis=-1, keepdims=True)
    e = jnp.exp(logits - m)
    s = jnp.sum(e, axis=-1, keepdims=True)
    o_ref[...] = (e * _exact_reciprocal(s)).astype(o_ref.dtype)


def _choose_tile_rows_resident(rows, k, n, isx, iso, weight_bytes, budget):
    # Streamed per-row bytes: double-buffered x tile + double-buffered out tile
    # + f32 logits/exp intermediates the softmax materializes.
    per_row = 2 * k * isx + 2 * n * iso + 2 * n * 4
    avail = max(budget - weight_bytes, 8 * per_row)
    t = (avail // per_row) // 8 * 8
    # >1024 rows buys <2% of HBM roofline but doubles streaming VMEM.
    t = int(max(8, min(t, 1024)))
    rows8 = _round_up(rows, 8)
    t = min(t, rows8)
    # Keep >=4 grid steps (>=2 per TensorCore on v7x megacore, >=3 on v5e/v6e)
    # so prefetch(i+1)/writeback(i-1) has something to overlap with.
    min_steps = 4
    if rows8 // t < min_steps:
        t = max(8, _round_up((rows + min_steps - 1) // min_steps, 8))
        t = min(t, rows8)
    return t


# ----------------------------------------------------------------------------
# Path 2: weight does NOT fit -> chunk N over an "arbitrary" grid axis.
# Logits accumulate (f32) in VMEM scratch; softmax finalized once per row tile.
# ----------------------------------------------------------------------------
def _chunked_kernel(x_ref, w_ref, b_ref, o_ref, acc_ref, *, tile_n, n_valid,
                    cast_bf16):
    # x_ref: (T, K)  w_ref: (K, tile_n)  b_ref: (1, tile_n)
    # o_ref: (T, Np) resident across the N axis   acc_ref: (T, Np) f32 scratch
    j = pl.program_id(1)
    x = x_ref[...]
    w = w_ref[...]
    if cast_bf16:
        x = x.astype(jnp.bfloat16)
        w = w.astype(jnp.bfloat16)
    logits = jnp.dot(x, w, preferred_element_type=jnp.float32)
    logits = logits + b_ref[...].astype(jnp.float32)
    col0 = pl.multiple_of(j * tile_n, 128)
    acc_ref[:, pl.ds(col0, tile_n)] = logits

    @pl.when(j == pl.num_programs(1) - 1)
    def _finalize():
        a = acc_ref[...]
        np_pad = a.shape[-1]
        if n_valid < np_pad:
            # Padded columns of the last (partial) weight chunk hold garbage;
            # mask them so they contribute exactly 0 to the softmax.
            cidx = jax.lax.broadcasted_iota(jnp.int32, a.shape, 1)
            a = jnp.where(cidx < n_valid, a, -jnp.inf)
        m = jnp.max(a, axis=-1, keepdims=True)
        e = jnp.exp(a - m)
        s = jnp.sum(e, axis=-1, keepdims=True)
        o_ref[...] = (e * _exact_reciprocal(s)).astype(o_ref.dtype)


def _choose_chunked_tiles(rows, k, n, isx, isw, iso, budget, chunk_tile_n=None):
    if chunk_tile_n is not None:
        tile_n = _round_up(int(chunk_tile_n), 128)
    else:
        tile_n = min(512, _round_up(n, 128))
    n_chunks = (n + tile_n - 1) // tile_n
    np_pad = n_chunks * tile_n

    fixed = 2 * k * tile_n * isw + 2 * tile_n * isw      # streamed W/b chunks
    per_row = (2 * k * isx            # x tile (double-buffered)
               + 2 * np_pad * iso     # resident output block
               + np_pad * 4           # f32 logits accumulator scratch
               + 2 * tile_n * 4)      # per-chunk f32 intermediates
    avail = max(budget - fixed, 8 * per_row)
    t = int(max(8, min((avail // per_row) // 8 * 8, 512)))
    rows8 = _round_up(rows, 8)
    t = min(t, rows8)
    if rows8 // t < 2 and rows8 >= 16:   # give both v7x TCs at least one row tile
        t = max(8, _round_up((rows + 1) // 2, 8))
        t = min(t, rows8)
    return t, tile_n, n_chunks, np_pad


# ----------------------------------------------------------------------------
# Wrapper
# ----------------------------------------------------------------------------
def projection_softmax_pallas(x2d, w_t, b, *, cast_matmul_to_bf16=False,
                              force_path=None, chunk_tile_n=None):
    """softmax(x2d @ w_t + b, axis=-1).  x2d:(rows,K)  w_t:(K,N)=W.T  b:(N,)."""
    rows, k = x2d.shape
    k2, n = w_t.shape
    assert k == k2 and b.shape == (n,)
    out_dtype = x2d.dtype
    isx = jnp.dtype(x2d.dtype).itemsize
    isw = jnp.dtype(w_t.dtype).itemsize
    iso = jnp.dtype(out_dtype).itemsize

    vmem_cap = _vmem_capacity_bytes()
    vmem_limit = int(min(vmem_cap * 3 // 4, 112 << 20))
    budget = int(vmem_limit * 0.8)           # headroom for compiler scratch
    b2d = b.reshape(1, n)

    # Constant-index blocks are (conservatively) double-buffered by the pipeline.
    weight_resident_bytes = 2 * (k * n + n) * isw
    min_rows_ws = 64 * (2 * k * isx + 2 * n * iso + 2 * n * 4)
    use_resident = (weight_resident_bytes + min_rows_ws) <= budget
    if force_path == "resident":
        use_resident = True
    elif force_path == "chunked":
        use_resident = False

    cost = pl.CostEstimate(
        flops=2 * rows * k * n,
        transcendentals=rows * n,
        bytes_accessed=rows * k * isx + k * n * isw + n * isw + rows * n * iso,
    )

    if use_resident:
        tile_rows = _choose_tile_rows_resident(rows, k, n, isx, iso,
                                               weight_resident_bytes, budget)
        grid = (pl.cdiv(rows, tile_rows),)
        return pl.pallas_call(
            functools.partial(_resident_kernel, cast_bf16=cast_matmul_to_bf16),
            out_shape=jax.ShapeDtypeStruct((rows, n), out_dtype),
            grid=grid,
            in_specs=[
                pl.BlockSpec((tile_rows, k), lambda i: (i, 0)),  # x row tile
                pl.BlockSpec((k, n), lambda i: (0, 0)),          # weight (resident)
                pl.BlockSpec((1, n), lambda i: (0, 0)),          # bias  (resident)
            ],
            out_specs=pl.BlockSpec((tile_rows, n), lambda i: (i, 0)),
            compiler_params=pltpu.CompilerParams(
                dimension_semantics=("parallel",),
                vmem_limit_bytes=vmem_limit),
            cost_estimate=cost,
        )(x2d, w_t, b2d)

    # Fallback: weight too large for residency (e.g. vocab projection on v7x).
    tile_rows, tile_n, n_chunks, np_pad = _choose_chunked_tiles(
        rows, k, n, isx, isw, iso, budget, chunk_tile_n)
    out = pl.pallas_call(
        functools.partial(_chunked_kernel, tile_n=tile_n, n_valid=n,
                          cast_bf16=cast_matmul_to_bf16),
        out_shape=jax.ShapeDtypeStruct((rows, np_pad), out_dtype),
        grid=(pl.cdiv(rows, tile_rows), n_chunks),
        in_specs=[
            pl.BlockSpec((tile_rows, k), lambda i, j: (i, 0)),   # x (fetched once per i)
            pl.BlockSpec((k, tile_n), lambda i, j: (0, j)),      # weight chunk
            pl.BlockSpec((1, tile_n), lambda i, j: (0, j)),      # bias chunk
        ],
        out_specs=pl.BlockSpec((tile_rows, np_pad), lambda i, j: (i, 0)),
        scratch_shapes=[pltpu.VMEM((tile_rows, np_pad), jnp.float32)],
        compiler_params=pltpu.CompilerParams(
            dimension_semantics=("parallel", "arbitrary"),
            vmem_limit_bytes=vmem_limit),
        cost_estimate=cost,
    )(x2d, w_t, b2d)
    return out[:, :n] if np_pad > n else out


def projection_layer_forward(x, w_t, b, **kwargs):
    """Mirrors ProjectionLayer.forward: softmax(linear(x), dim=-1). x: (..., K)."""
    lead = x.shape[:-1]
    x2d = x.reshape((-1, x.shape[-1]))
    y2d = projection_softmax_pallas(x2d, w_t, b, **kwargs)
    return y2d.reshape(lead + (w_t.shape[1],))


if __name__ == "__main__":
    key = jax.random.PRNGKey(0)
    batch, seq, embedding_dim, output_dim = 2, 8, 32, 16
    kx, kw, kb, kw2, kb2 = jax.random.split(key, 5)

    x = jax.random.normal(kx, (batch, seq, embedding_dim), dtype=jnp.float32)
    # nn.Linear(embedding_dim, output_dim): y = x @ W.T + b.  Store W.T directly.
    w = jax.random.normal(kw, (output_dim, embedding_dim), jnp.float32) / jnp.sqrt(
        jnp.float32(embedding_dim))
    w_t = w.T
    b = jax.random.normal(kb, (output_dim,), jnp.float32) * 0.1

    # Main (weight-resident) path.
    out = projection_layer_forward(x, w_t, b)
    out = jax.block_until_ready(out)
    ref = jax.nn.softmax(jnp.einsum("bsk,kn->bsn", x, w_t) + b, axis=-1)
    assert out.shape == ref.shape
    assert jnp.allclose(out, ref, atol=1e-4, rtol=1e-4), "resident path mismatch"
    assert jnp.allclose(jnp.sum(out, axis=-1), 1.0, atol=1e-4), "rows must sum to 1"

    # N-chunked fallback path (forced, small shapes): exercises streaming the
    # weight over the 'arbitrary' axis, the f32 accumulator and column masking.
    out_dim2 = 200   # not a multiple of the 128-wide chunk -> partial last chunk
    w2 = jax.random.normal(kw2, (out_dim2, embedding_dim), jnp.float32) / jnp.sqrt(
        jnp.float32(embedding_dim))
    b2 = jax.random.normal(kb2, (out_dim2,), jnp.float32) * 0.1
    x2 = jax.random.normal(kx, (4, 16, embedding_dim), dtype=jnp.float32)
    out2 = projection_layer_forward(x2, w2.T, b2, force_path="chunked",
                                    chunk_tile_n=128)
    out2 = jax.block_until_ready(out2)
    ref2 = jax.nn.softmax(jnp.einsum("bsk,kn->bsn", x2, w2.T) + b2, axis=-1)
    assert out2.shape == ref2.shape
    assert jnp.allclose(out2, ref2, atol=1e-4, rtol=1e-4), "chunked path mismatch"
    assert jnp.allclose(jnp.sum(out2, axis=-1), 1.0, atol=1e-4), "rows must sum to 1"

    print("KERNEL_OK")
</pallas_src>

<mosaic_0001>
module attributes {stable_mosaic.version = 11 : i64} {
  func.func @_resident_kernel(%arg0: i32, %arg1: memref<8x32xf32, #tpu.memory_space<vmem>>, %arg2: memref<32x16xf32, #tpu.memory_space<vmem>>, %arg3: memref<1x16xf32, #tpu.memory_space<vmem>>, %arg4: memref<8x16xf32, #tpu.memory_space<vmem>>) attributes {dimension_semantics = [#tpu.dimension_semantics<parallel>], iteration_bounds = array<i64: 2>, scalar_prefetch = 0 : i64, scratch_operands = 0 : i64, tpu.core_type = #tpu.core_type<tc>, window_params = [{transform_indices = @transform_0, window_bounds = array<i64: 8, 32>}, {pipeline_mode = #tpu.pipeline_mode<synchronous>, transform_indices = @transform_1, window_bounds = array<i64: 32, 16>}, {pipeline_mode = #tpu.pipeline_mode<synchronous>, transform_indices = @transform_2, window_bounds = array<i64: 1, 16>}, {transform_indices = @transform_3, window_bounds = array<i64: 8, 16>}]} {
    %c0 = arith.constant 0 : index
    %c0_0 = arith.constant 0 : index
    %0 = vector.load %arg1[%c0, %c0_0] : memref<8x32xf32, #tpu.memory_space<vmem>>, vector<8x32xf32>
    %c0_1 = arith.constant 0 : index
    %c0_2 = arith.constant 0 : index
    %1 = vector.load %arg2[%c0_1, %c0_2] : memref<32x16xf32, #tpu.memory_space<vmem>>, vector<32x16xf32>
    %cst = arith.constant dense<0.000000e+00> : vector<8x16xf32>
    %2 = tpu.matmul %0, %1, %cst {dimension_numbers = #tpu.dot_dimension_numbers<[1], [0], [0], [1], [0, 0, 1, 1], [], []>} : vector<8x32xf32>, vector<32x16xf32>, vector<8x16xf32> -> vector<8x16xf32>
    %c0_3 = arith.constant 0 : index
    %c0_4 = arith.constant 0 : index
    %3 = vector.load %arg3[%c0_3, %c0_4] : memref<1x16xf32, #tpu.memory_space<vmem>>, vector<1x16xf32>
    %4 = vector.broadcast %3 : vector<1x16xf32> to vector<8x16xf32>
    %5 = arith.addf %2, %4 : vector<8x16xf32>
    %cst_5 = arith.constant dense<0xFF800000> : vector<8xf32>
    %6 = vector.multi_reduction <maximumf>, %5, %cst_5 [1] : vector<8x16xf32> to vector<8xf32>
    %7 = vector.shape_cast %6 : vector<8xf32> to vector<8x1xf32>
    %8 = vector.broadcast %7 : vector<8x1xf32> to vector<8x16xf32>
    %9 = arith.subf %5, %8 : vector<8x16xf32>
    %10 = math.exp %9 : vector<8x16xf32>
    %cst_6 = arith.constant dense<0.000000e+00> : vector<8xf32>
    %11 = vector.multi_reduction <add>, %10, %cst_6 [1] : vector<8x16xf32> to vector<8xf32>
    %12 = vector.shape_cast %11 : vector<8xf32> to vector<8x1xf32>
    %13 = tpu.reciprocal %12 {approx = true} : vector<8x1xf32> -> vector<8x1xf32>
    %14 = arith.mulf %12, %13 : vector<8x1xf32>
    %cst_7 = arith.constant 2.000000e+00 : f32
    %15 = vector.broadcast %cst_7 : f32 to vector<8x1xf32>
    %16 = arith.subf %15, %14 : vector<8x1xf32>
    %17 = arith.mulf %13, %16 : vector<8x1xf32>
    %18 = vector.broadcast %17 : vector<8x1xf32> to vector<8x16xf32>
    %19 = arith.mulf %10, %18 : vector<8x16xf32>
    %c0_8 = arith.constant 0 : index
    %c0_9 = arith.constant 0 : index
    %20 = vector.load %arg4[%c0_8, %c0_9] : memref<8x16xf32, #tpu.memory_space<vmem>>, vector<8x16xf32>
    tpu.vector_store %arg4[%c0_8, %c0_9], %19 {strides = array<i32>} : memref<8x16xf32, #tpu.memory_space<vmem>>, vector<8x16xf32>,
    return
  }
  func.func @transform_0(%arg0: i32) -> (i32, i32) {
    %c0_i32 = arith.constant 0 : i32
    %c0_i32_0 = arith.constant 0 : i32
    return %arg0, %c0_i32 : i32, i32
  }
  func.func @transform_1(%arg0: i32) -> (i32, i32) {
    %c0_i32 = arith.constant 0 : i32
    %c0_i32_0 = arith.constant 0 : i32
    %c0_i32_1 = arith.constant 0 : i32
    return %c0_i32, %c0_i32_0 : i32, i32
  }
  func.func @transform_2(%arg0: i32) -> (i32, i32) {
    %c0_i32 = arith.constant 0 : i32
    %c0_i32_0 = arith.constant 0 : i32
    %c0_i32_1 = arith.constant 0 : i32
    return %c0_i32, %c0_i32_0 : i32, i32
  }
  func.func @transform_3(%arg0: i32) -> (i32, i32) {
    %c0_i32 = arith.constant 0 : i32
    %c0_i32_0 = arith.constant 0 : i32
    return %arg0, %c0_i32 : i32, i32
  }
}

</mosaic_0001>

<bundles_post_ra>
// kernel: tpu_custom_call.1
= control target key start
LH: loop header
LB: loop body
LE: loop exit
PB: predicated region body
PF: predicated region fallthrough
CT: control target
= control target key end

     0   :  { %8 = vsyncpa [#allocation3], 0  ;;  %s532_s0 = inlined_call_operand.vmem [shape: f32[16,32], index: 0, kind: input, shape index: {}]   ;;  %s533_s1 = inlined_call_operand.vmem [shape: f32[32,16], index: 1, kind: input, shape index: {}]   ;;  %s534_s2 = inlined_call_operand.vmem [shape: f32[1,16], index: 2, kind: input, shape index: {}]   ;;  %s535_s3 = inlined_call_operand.hbm [shape: f32[16,16], index: 3, kind: output, shape index: {}]  }
   0x1   :  { %10 = vsyncpa [#allocation3 + $0x1], 0  ;;  %s429_s12 = smov 0   ;;  %s431_s13 = smov 0  }
   0x2   :  { %s433_s14 = smov 0   ;;  %s435_s15 = smov 0  }
   0x3 LB: > { %s450_s16 = sadd.s32 4294967295, %s407_s15   ;;  %s290_s17 = sadd.s32 4294967294, %s407_s15   ;;  %s407_s15 = sphi %s435_s15, %s541_s15   ;;  %s403_s14 = sphi %s433_s14, %s540_s14   ;;  %s399_s13 = sphi %s431_s13, %s539_s13   ;;  %s395_s12 = sphi %s429_s12, %s538_s12  }
   0x4   : > { %s454_s18 = sadd.s32 1, %s407_s15   ;;  %s91_s19 = sadd.s32 1, %s403_s14 }
   0x5   : > { %s88_s20 = ssub.s32 %s407_s15, %s454_s18  ;;  %p101_p0 = scmp.ne.s32.totalorder %s403_s14, %s399_s13 }
   0x6   : > { %p89_p1 = scmp.eq.s32.totalorder %s88_s20, 0  ;;  %p102_p2 = scmp.eq.s32.totalorder %s450_s16, 1 }
   0x7   : > { %p107_p3 = scmp.ne.s32.totalorder %s399_s13, %s395_s12  ;;  %p108_p4 = scmp.eq.s32.totalorder %s290_s17, 1 }
   0x8   : > { %s465_s21 = scalar_select %p89_p1, %s403_s14, %s91_s19  }
   0x9   : > { %p467_p5 = por %p102_p2, %p101_p0  ;;  %p471_p6 = por %p108_p4, %p107_p3 }
   0xa   : > { %p293_p7 = scmp.ge.s32.totalorder %s407_s15, 1  ;;  %p139_p8 = scmp.lt.s32.totalorder %s407_s15, 3 }
   0xc   : > { %p140_p9 = pnand %p293_p7, %p139_p8 }
   0xd   : > { %p162_p10 = scmp.lt.s32.totalorder (!%p140_p9), %s450_s16, 1  ;;  %s159_s17 = sand.u32 (!%p140_p9), 1, %s399_s13  }
   0xe   : > { %143 = sbr.rel (%p140_p9) target bundleno = 418 (0x1a2), region = 32  ;;  %s294_s19 = sshll.u32 (!%p140_p9), %s159_s17, 3 }
   0xf   : > { %s298_s20 = sshll.u32 (!%p140_p9), %s450_s16, 3  ;;  %s161_s27 = scalar_lea.vmem (!%p140_p9), [#allocation2], %s294_s19 }
  0x10   : > { %s226_s26 = scalar_lea.hbm (!%p140_p9), %s535_s3, %s298_s20  ;;  %s228_s28 = sshll.u32 (!%p140_p9), %s161_s27, 4  ;;  %s229_s28 = int_to_ptr.vmem [resolvable:$true] %s228_s28 }
  0x11   : > { %s230_s29 = sshll.u32 (!%p140_p9), %s226_s26, 4  ;;  %s365_s7 = scalar_lea.hbm (!%p140_p9), %s535_s3, 16  ;;  %s231_s29 = int_to_ptr.hbm [resolvable:$true] %s230_s29 }
  0x12   : > { %s359_s4 = sshra.s32 (!%p140_p9), %s231_s29, 4  ;;  %s360_s4 = int_to_ptr.hbm [resolvable:$true] %s359_s4 }
  0x13   : > { %v170_v0 = vld [vmem:[%s533_s1 + $0x18] sm:$0xff]  ;;  %v169_v1 = vld [vmem:[%s533_s1 + $0x10] sm:$0xff]  ;;  %v168_v2 = vld [vmem:[%s533_s1 + $0x8] sm:$0xff]  ;;  %s163_s30 = scalar_select %p162_p10, %s450_s16, 1  ;;  %vm175_vm0 = vcmask 261120   ;;  %vm199_vm1 = vcmask 130048  }
  0x14   : > { %191 = vmatpush.msra.mxu0 %v170_v0  ;;  %v167_v3 = vld [vmem:[%s533_s1] sm:$0xff]  ;;  %s361_s16 = scalar_lea.hbm %s360_s4, 8  ;;  %p366_p0 = scmp.lt.s32.totalorder %s360_s4, %s535_s3 }
  0x15   : > { %s295_s6 = sshll.u32 %s163_s30, 3  ;;  %v340_v5 = vld [vmem:[%s534_s2] ss:$0 sm:$0xff]  ;;  %s216_s30 = scalar_lea.sflag [#allocation3], %s159_s17 }
  0x16   : > { %192 = vmatpush.msra.mxu0 %v169_v1  ;;  %s165_s9 = scalar_lea.vmem %s532_s0, %s295_s6  ;;  %p362_p11 = scmp.ne.s32.totalorder %s360_s4, %s361_s16 }
  0x17   : > { %v166_v4 = vld [vmem:[%s165_s9] sm:$0xff]  ;;  %p367_p1 = scmp.lt.s32.totalorder %s365_s7, %s361_s16 }
  0x18   : > { %193 = vmatpush.msra.mxu0 %v168_v2  ;;  %p363_p12 = pnand %p362_p11, %p467_p5 }
  0x19   : > { %p368_p2 = por %p367_p1, %p366_p0 }
  0x1a   : > { %194 = vmatpush.msra.mxu0 %v167_v3  ;;  %p364_p13 = pneg %p363_p12 }
  0x1b   : > { %296 = vmatmul.msk.f32.vlgmr.msra.gmra.mxu0 %vm175_vm0, %v166_v4 }
  0x1c   : > { %p369_p3 = pnand %p368_p2, %p364_p13 }
  0x98   : > { %v196_v6 = vpop.f32.mrf.mxu0 }
  0x99   : > { %v197_v7 = vadd.f32 %v340_v5, %v196_v6 }
  0x9b   : > { %v200_v8 = vsel %vm199_vm1, %v197_v7, -inf }
  0x9c   : > { %201 = vmax.xlane.f32.xlu0 %v200_v8 }
 0x10f   : > { %v202_v9 = vpop.xlane.xlu0 %201 }
 0x110   : > { %v203_v10 = vsub.f32 %v197_v7, %v202_v9 }
 0x112   : > { %v204_v11 = vmul.f32 1.442695, %v203_v10 }
 0x114   : > { %341 = vpow2.f32 %v204_v11 }
 0x11a   : > { %v342_v12 = vpop.eup %341 }
 0x11b   : > { %v206_v13 = vsel %vm199_vm1, %v342_v12, 0.0 }
 0x11c   : > { %207 = vadd.xlane.f32.xlu0 %v206_v13 }
 0x18f   : > { %v208_v14 = vpop.xlane.xlu0 %207 }
 0x190   : > { %343 = vrcp.f32 %v208_v14 }
 0x196   : > { %v344_v15 = vpop.eup %343 }
 0x197   : > { %v210_v16 = vmul.f32 %v344_v15, %v208_v14 }
 0x199   : > { %v211_v17 = vsub.f32 2.0, %v210_v16 }
 0x19b   : > { %v212_v18 = vmul.f32 %v344_v15, %v211_v17 }
 0x19d   : > { %v213_v19 = vmul.f32 %v342_v12, %v212_v18 }
 0x19f   : > { %214 = vst.msk [vmem:[%s161_s27] sm:$0xff] %vm199_vm1, %v213_v19 }
 0x1a0   : > { %372 = shalt.err (!%p369_p3)
}
 0x1a1   : > { %301 = dma.vmem_to_hbm [thread:$0]  (%p467_p5), %s229_s28, 128, %s231_s29, %s216_s30  }
 0x1a2 PF: > { %p307_p4 = scmp.ge.s32.totalorder %s407_s15, 2  ;;  %s242_s10 = sand.u32 1, %s395_s12  }
 0x1a3   : > { %s243_s11 = scalar_lea.sflag [#allocation3], %s242_s10 }
 0x1a4   : > { %p304_p7 = pnand %p307_p4, %p471_p6 }
 0x1a6   : > { %p305_p8 = pneg %p304_p7 }
 0x1a8   : > { %390 = dma.done.wait (%p305_p8), %s243_s11, 128  }
 0x1a9   : > { %392 = vsyncadd (%p305_p8), %s243_s11, 4294967168  ;;  %p13_p9 = scmp.ge.s32.totalorder %s454_s18, 4   ;;  %s538_s12 = smov %s399_s13 }
 0x1aa   : > { %s539_s13 = smov %s403_s14  ;;  %s540_s14 = smov %s465_s21 }
 0x1ab   : > { %s541_s15 = smov %s454_s18  ;;  %15 = sbr.rel (!%p13_p9) target bundleno = 3 (0x3), region = 67 }
 0x1b0   :  { %249 = vsyncpa [#allocation3], 1 }
 0x1b1   :  { %251 = vsyncpa [#allocation3 + $0x1], 1 }

</bundles_post_ra>
